<compile_context>
chip_gen: v5e
topology: v5e:2x2
jax: 0.10.0
libtpu: 0.0.40
codegen_flags: <defaults>
</compile_context>

<pallas_src>
import jax
import jax.numpy as jnp
from jax.experimental import pallas as pl
from jax.experimental.pallas import tpu as pltpu


def _round_up(x, m):
    return (x + m - 1) // m * m


def _time_embedding_kernel(t_ref, w1_ref, b1_ref, w2_ref, b2_ref, o_ref):
    x = t_ref[...]
    mm_dtype = w1_ref.dtype
    if x.dtype != mm_dtype:
        x = x.astype(mm_dtype)

    # Linear 1 on the MXU, f32 accumulate; bias add in f32.
    h = jnp.dot(x, w1_ref[...], preferred_element_type=jnp.float32)
    h = h + b1_ref[...]

    # SiLU in f32: sigmoid rides the EUP slot, multiply on the VPU
    # (v5e has no bf16 VPU/EUP, so the f32 contract is kept on all chips).
    h = h * jax.nn.sigmoid(h)

    # Cast only on the bf16-weight path (explicit precision contract).
    if w2_ref.dtype != jnp.float32:
        h = h.astype(w2_ref.dtype)

    # Linear 2 on the MXU, f32 accumulate; bias add in f32.
    out = jnp.dot(h, w2_ref[...], preferred_element_type=jnp.float32)
    out = out + b2_ref[...]

    o_ref[...] = out.astype(o_ref.dtype)


def pack_time_embedding_params(w1, b1, w2, b2, *, compute_dtype=jnp.bfloat16):
    """One-time packing of Linear params into lane-dense block-diagonal form.

    w1 : [D, 4D], b1 : [4D] or [1, 4D]   (weights stored as [in, out], i.e.
    w2 : [4D, D], b2 : [D]  or [1, D]     transposed vs. torch nn.Linear.weight)

    Call once at model init; reuse the returned dict for every forward call.
    """
    D, H = w1.shape
    assert w2.shape == (H, D), (w1.shape, w2.shape)
    w1 = jnp.asarray(w1, jnp.float32)
    w2 = jnp.asarray(w2, jnp.float32)
    b1 = jnp.asarray(b1, jnp.float32).reshape(1, H)
    b2 = jnp.asarray(b2, jnp.float32).reshape(1, D)

    # Lane-dense packing factor.  If D does not divide 128 we fall back to
    # P = 1 (still correct, but lane-sparse: stores become masked partial vst).
    P = 128 // D if (128 % D == 0 and D < 128) else 1
    if P > 1:
        eye = jnp.eye(P, dtype=jnp.float32)
        w1k = jnp.kron(eye, w1)            # [P*D, P*H]
        w2k = jnp.kron(eye, w2)            # [P*H, P*D]
        b1k = jnp.tile(b1, (1, P))         # [1, P*H]
        b2k = jnp.tile(b2, (1, P))         # [1, P*D]
    else:
        w1k, w2k, b1k, b2k = w1, w2, b1, b2

    if compute_dtype != jnp.float32:
        # Only the MXU sees this dtype; biases / SiLU stay f32.
        w1k = w1k.astype(compute_dtype)
        w2k = w2k.astype(compute_dtype)

    return {
        "D": D, "H": H, "P": P, "Din": P * D, "Hin": P * H,
        "w1": w1k, "b1": b1k, "w2": w2k, "b2": b2k,
    }


def time_embedding(t, params, *, block_rows=512):
    """Fused MLP: silu(t @ w1 + b1) @ w2 + b2, on pre-packed params.

    t          : [B, D]  (f32 or bf16; output dtype follows t.dtype, so a
                          bf16 caller gets bf16 HBM I/O for free)
    params     : dict from pack_time_embedding_params()
    block_rows : target packed rows per grid step (>= 512 keeps the kernel
                 near the HBM roofline; rounded up to 8 sublanes).
    """
    B, D = t.shape
    P, Din, Hin = params["P"], params["Din"], params["Hin"]
    assert D == params["D"], (D, params["D"])
    w1k, b1k, w2k, b2k = params["w1"], params["b1"], params["w2"], params["b2"]

    # Pad only to a multiple of P (<= P-1 rows, often nothing) so the free
    # row-major repack [B, D] -> [B/P, 128] is exact.  Ragged last *tiles*
    # are handled by Pallas OOB masking, not by padding to the tile size.
    B_pad = _round_up(B, P)
    tp = t
    if B_pad != B:
        tp = jnp.pad(t, ((0, B_pad - B), (0, 0)))
    r = B_pad // P
    tp = tp.reshape(r, Din)

    # Tile selection: big 8-aligned tiles; for moderate batches split into
    # >= 2 grid steps so v7x megacore has something to shard across cores.
    tr_target = max(8, _round_up(block_rows, 8))
    if r <= tr_target:
        if r >= 16:
            tr = _round_up(pl.cdiv(r, 2), 8)
        else:
            tr = r                     # single full-extent tile (always legal)
    else:
        tr = tr_target
    grid = (pl.cdiv(r, tr),)

    io_itemsize = jnp.dtype(t.dtype).itemsize
    w_itemsize = jnp.dtype(w1k.dtype).itemsize
    weight_bytes = 2 * Din * Hin * w_itemsize + (Hin + Din) * 4
    cost = pl.CostEstimate(
        flops=4 * r * Din * Hin,                       # two r x Din x Hin GEMMs
        transcendentals=r * Hin,                       # sigmoid
        bytes_accessed=2 * r * Din * io_itemsize + weight_bytes,
    )

    # Double-buffered in/out tiles + resident weights, with generous headroom.
    est_vmem = (4 * tr * Din * io_itemsize              # in + out, 2 buffers each
                + 2 * 2 * Din * Hin * w_itemsize        # w1 + w2, 2 buffers each
                + 2 * (Hin + Din) * 4)                  # biases
    vmem_limit = min(32 << 20, max(16 << 20, 2 * est_vmem))

    out_packed = pl.pallas_call(
        _time_embedding_kernel,
        out_shape=jax.ShapeDtypeStruct((r, Din), t.dtype),
        grid=grid,
        in_specs=[
            pl.BlockSpec((tr, Din), lambda i: (i, 0)),    # packed t tile
            pl.BlockSpec((Din, Hin), lambda i: (0, 0)),   # w1 (VMEM-resident)
            pl.BlockSpec((1, Hin), lambda i: (0, 0)),     # b1 (VMEM-resident)
            pl.BlockSpec((Hin, Din), lambda i: (0, 0)),   # w2 (VMEM-resident)
            pl.BlockSpec((1, Din), lambda i: (0, 0)),     # b2 (VMEM-resident)
        ],
        out_specs=pl.BlockSpec((tr, Din), lambda i: (i, 0)),
        compiler_params=pltpu.CompilerParams(
            dimension_semantics=("parallel",),
            vmem_limit_bytes=int(vmem_limit)),
        cost_estimate=cost,
    )(tp, w1k, b1k, w2k, b2k)

    out = out_packed.reshape(B_pad, D)
    if B_pad != B:
        out = out[:B]
    return out


def time_embedding_ref(t, w1, b1, w2, b2):
    h = t @ w1 + b1.reshape(1, -1)
    h = h * jax.nn.sigmoid(h)
    return h @ w2 + b2.reshape(1, -1)


if __name__ == "__main__":
    embedding_dim = 16
    D, H = embedding_dim, 4 * embedding_dim

    key = jax.random.PRNGKey(0)
    k_t, k_w1, k_b1, k_w2, k_b2, k_tb = jax.random.split(key, 6)

    # Deterministic synthetic parameters (nn.Linear(16, 64) / nn.Linear(64, 16),
    # stored as [in, out]).
    w1 = jax.random.normal(k_w1, (D, H), dtype=jnp.float32) * (1.0 / jnp.sqrt(D))
    b1 = jax.random.normal(k_b1, (1, H), dtype=jnp.float32) * 0.01
    w2 = jax.random.normal(k_w2, (H, D), dtype=jnp.float32) * (1.0 / jnp.sqrt(H))
    b2 = jax.random.normal(k_b2, (1, D), dtype=jnp.float32) * 0.01

    # Packed (kron'd / tiled / cast) params built ONCE, at "model init".
    params_f32 = pack_time_embedding_params(w1, b1, w2, b2,
                                            compute_dtype=jnp.float32)
    params_bf16 = pack_time_embedding_params(w1, b1, w2, b2)   # bf16 MXU default

    # Small case matching the PyTorch module usage (single [1, 128] packed tile).
    batch = 8
    t_small = jax.random.normal(k_t, (batch, D), dtype=jnp.float32)
    ref_small = time_embedding_ref(t_small, w1, b1, w2, b2)
    out_small = jax.block_until_ready(time_embedding(t_small, params_f32))
    assert out_small.shape == (batch, D), out_small.shape
    assert jnp.allclose(out_small, ref_small, atol=1e-4, rtol=1e-4), \
        "small-batch f32 mismatch vs reference"

    # Batched + ragged case: exercises the B grid (>= 2 parallel steps for v7x
    # megacore), the <= P-1 row pad, and Pallas masking of the ragged last tile.
    big_batch = 997
    t_big = jax.random.normal(k_tb, (big_batch, D), dtype=jnp.float32)
    ref_big = time_embedding_ref(t_big, w1, b1, w2, b2)

    out_big_f32 = jax.block_until_ready(time_embedding(t_big, params_f32))
    assert out_big_f32.shape == (big_batch, D), out_big_f32.shape
    assert jnp.allclose(out_big_f32, ref_big, atol=1e-4, rtol=1e-4), \
        "batched f32 mismatch vs reference"

    # Default bf16-weight MXU path (f32 bias / SiLU / accumulate).
    out_big_bf16 = jax.block_until_ready(time_embedding(t_big, params_bf16))
    assert jnp.allclose(out_big_bf16, ref_big, atol=0.2, rtol=0.05), \
        "bf16-weight variant mismatch vs reference"

    # bf16 HBM I/O contract (caller keeps t/out in bf16): halves t/out traffic,
    # the only remaining lever once tiles are large and weights are amortized.
    out_bf16_io = jax.block_until_ready(
        time_embedding(t_big.astype(jnp.bfloat16), params_bf16))
    assert out_bf16_io.dtype == jnp.bfloat16, out_bf16_io.dtype
    assert jnp.allclose(out_bf16_io.astype(jnp.float32), ref_big,
                        atol=0.2, rtol=0.05), \
        "bf16-I/O variant mismatch vs reference"

    print("KERNEL_OK")
</pallas_src>

<mosaic_0001>
module attributes {stable_mosaic.version = 11 : i64} {
  func.func @_time_embedding_kernel(%arg0: i32, %arg1: memref<1x128xf32, #tpu.memory_space<vmem>>, %arg2: memref<128x512xf32, #tpu.memory_space<vmem>>, %arg3: memref<1x512xf32, #tpu.memory_space<vmem>>, %arg4: memref<512x128xf32, #tpu.memory_space<vmem>>, %arg5: memref<1x128xf32, #tpu.memory_space<vmem>>, %arg6: memref<1x128xf32, #tpu.memory_space<vmem>>) attributes {dimension_semantics = [#tpu.dimension_semantics<parallel>], iteration_bounds = array<i64: 1>, scalar_prefetch = 0 : i64, scratch_operands = 0 : i64, tpu.core_type = #tpu.core_type<tc>, window_params = [{transform_indices = @transform_0, window_bounds = array<i64: 1, 128>}, {pipeline_mode = #tpu.pipeline_mode<synchronous>, transform_indices = @transform_1, window_bounds = array<i64: 128, 512>}, {pipeline_mode = #tpu.pipeline_mode<synchronous>, transform_indices = @transform_2, window_bounds = array<i64: 1, 512>}, {pipeline_mode = #tpu.pipeline_mode<synchronous>, transform_indices = @transform_3, window_bounds = array<i64: 512, 128>}, {pipeline_mode = #tpu.pipeline_mode<synchronous>, transform_indices = @transform_4, window_bounds = array<i64: 1, 128>}, {transform_indices = @transform_5, window_bounds = array<i64: 1, 128>}]} {
    %c0 = arith.constant 0 : index
    %c0_0 = arith.constant 0 : index
    %0 = vector.load %arg1[%c0, %c0_0] : memref<1x128xf32, #tpu.memory_space<vmem>>, vector<1x128xf32>
    %c0_1 = arith.constant 0 : index
    %c0_2 = arith.constant 0 : index
    %1 = vector.load %arg2[%c0_1, %c0_2] : memref<128x512xf32, #tpu.memory_space<vmem>>, vector<128x512xf32>
    %cst = arith.constant dense<0.000000e+00> : vector<1x512xf32>
    %2 = tpu.matmul %0, %1, %cst {dimension_numbers = #tpu.dot_dimension_numbers<[1], [0], [0], [1], [0, 0, 1, 1], [], []>} : vector<1x128xf32>, vector<128x512xf32>, vector<1x512xf32> -> vector<1x512xf32>
    %c0_3 = arith.constant 0 : index
    %c0_4 = arith.constant 0 : index
    %3 = vector.load %arg3[%c0_3, %c0_4] : memref<1x512xf32, #tpu.memory_space<vmem>>, vector<1x512xf32>
    %4 = arith.addf %2, %3 : vector<1x512xf32>
    %5 = arith.negf %4 : vector<1x512xf32>
    %6 = math.exp %5 : vector<1x512xf32>
    %cst_5 = arith.constant 1.000000e+00 : f32
    %7 = vector.broadcast %cst_5 : f32 to vector<1x512xf32>
    %8 = arith.addf %7, %6 : vector<1x512xf32>
    %9 = arith.divf %7, %8 : vector<1x512xf32>
    %10 = arith.mulf %4, %9 : vector<1x512xf32>
    %c0_6 = arith.constant 0 : index
    %c0_7 = arith.constant 0 : index
    %11 = vector.load %arg4[%c0_6, %c0_7] : memref<512x128xf32, #tpu.memory_space<vmem>>, vector<512x128xf32>
    %cst_8 = arith.constant dense<0.000000e+00> : vector<1x128xf32>
    %12 = tpu.matmul %10, %11, %cst_8 {dimension_numbers = #tpu.dot_dimension_numbers<[1], [0], [0], [1], [0, 0, 1, 1], [], []>} : vector<1x512xf32>, vector<512x128xf32>, vector<1x128xf32> -> vector<1x128xf32>
    %c0_9 = arith.constant 0 : index
    %c0_10 = arith.constant 0 : index
    %13 = vector.load %arg5[%c0_9, %c0_10] : memref<1x128xf32, #tpu.memory_space<vmem>>, vector<1x128xf32>
    %14 = arith.addf %12, %13 : vector<1x128xf32>
    %c0_11 = arith.constant 0 : index
    %c0_12 = arith.constant 0 : index
    %15 = vector.load %arg6[%c0_11, %c0_12] : memref<1x128xf32, #tpu.memory_space<vmem>>, vector<1x128xf32>
    tpu.vector_store %arg6[%c0_11, %c0_12], %14 {strides = array<i32>} : memref<1x128xf32, #tpu.memory_space<vmem>>, vector<1x128xf32>,
    return
  }
  func.func @transform_0(%arg0: i32) -> (i32, i32) {
    %c0_i32 = arith.constant 0 : i32
    %c0_i32_0 = arith.constant 0 : i32
    return %arg0, %c0_i32 : i32, i32
  }
  func.func @transform_1(%arg0: i32) -> (i32, i32) {
    %c0_i32 = arith.constant 0 : i32
    %c0_i32_0 = arith.constant 0 : i32
    %c0_i32_1 = arith.constant 0 : i32
    return %c0_i32, %c0_i32_0 : i32, i32
  }
  func.func @transform_2(%arg0: i32) -> (i32, i32) {
    %c0_i32 = arith.constant 0 : i32
    %c0_i32_0 = arith.constant 0 : i32
    %c0_i32_1 = arith.constant 0 : i32
    return %c0_i32, %c0_i32_0 : i32, i32
  }
  func.func @transform_3(%arg0: i32) -> (i32, i32) {
    %c0_i32 = arith.constant 0 : i32
    %c0_i32_0 = arith.constant 0 : i32
    %c0_i32_1 = arith.constant 0 : i32
    return %c0_i32, %c0_i32_0 : i32, i32
  }
  func.func @transform_4(%arg0: i32) -> (i32, i32) {
    %c0_i32 = arith.constant 0 : i32
    %c0_i32_0 = arith.constant 0 : i32
    %c0_i32_1 = arith.constant 0 : i32
    return %c0_i32, %c0_i32_0 : i32, i32
  }
  func.func @transform_5(%arg0: i32) -> (i32, i32) {
    %c0_i32 = arith.constant 0 : i32
    %c0_i32_0 = arith.constant 0 : i32
    return %arg0, %c0_i32 : i32, i32
  }
}

</mosaic_0001>

<bundles_post_ra>
// kernel: tpu_custom_call.1
= control target key start
LH: loop header
LB: loop body
LE: loop exit
PB: predicated region body
PF: predicated region fallthrough
CT: control target
= control target key end

     0   :  { %10 = vsyncpa [#allocation3], 0  ;;  %s716_s0 = inlined_call_operand.hbm [shape: f32[1,128], index: 0, kind: input, shape index: {}]   ;;  %s717_s1 = inlined_call_operand.hbm [shape: f32[128,512], index: 1, kind: input, shape index: {}]   ;;  %s718_s2 = inlined_call_operand.hbm [shape: f32[1,512], index: 2, kind: input, shape index: {}]   ;;  %s719_s3 = inlined_call_operand.hbm [shape: f32[512,128], index: 3, kind: input, shape index: {}]   ;;  %s720_s4 = inlined_call_operand.vmem [shape: f32[1,128], index: 4, kind: input, shape index: {}]   ;;  %s721_s5 = inlined_call_operand.hbm [shape: f32[1,128], index: 5, kind: output, shape index: {}]  }
   0x1   :  { %11 = vsyncpa [#allocation6], 0 }
   0x2   :  { %12 = vsyncpa [#allocation9], 0  ;;  %s29_s20 = sshll.u32 %s717_s1, 4  ;;  %s30_s20 = int_to_ptr.hbm [resolvable:$true] %s29_s20 }
   0x3   :  { %13 = vsyncpa [#allocation4], 0  ;;  %s637_s21 = smov [#allocation5]   ;;  %s19_s25 = sshll.u32 %s716_s0, 4  ;;  %s20_s25 = int_to_ptr.hbm [resolvable:$true] %s19_s25 }
   0x4   :  { %s31_s22 = sshll.u32 %s637_s21, 4  ;;  %s638_s26 = smov 512   ;;  %s32_s22 = int_to_ptr.vmem [resolvable:$true] %s31_s22 }
   0x5   :  { %s639_s27 = smov 32   ;;  %s640_s28 = smov [#allocation2]  }
   0x6   :  { %37 = dma.hbm_to_vmem [thread:$0]  %s30_s20, 8192, %s32_s22, [#allocation6], %s638_s26, %s638_s26, %s639_s27  }
   0x7   :  { %s21_s29 = sshll.u32 %s640_s28, 4  ;;  %s43_s7 = sshll.u32 %s718_s2, 4  ;;  %s22_s29 = int_to_ptr.vmem [resolvable:$true] %s21_s29  ;;  %s44_s7 = int_to_ptr.hbm [resolvable:$true] %s43_s7 }
   0x8   :  { %24 = dma.hbm_to_vmem [thread:$0]  %s20_s25, 16, %s22_s29, [#allocation3]  }
   0x9   :  { %s53_s9 = sshll.u32 %s719_s3, 4  ;;  %s641_s10 = smov [#allocation7]   ;;  %s54_s9 = int_to_ptr.hbm [resolvable:$true] %s53_s9 }
   0xa   :  { %s45_s11 = sshll.u32 %s641_s10, 4  ;;  %s642_s0 = smov [#allocation8]   ;;  %s46_s11 = int_to_ptr.vmem [resolvable:$true] %s45_s11 }
   0xb   :  { %48 = dma.hbm_to_vmem [thread:$0]  %s44_s7, 64, %s46_s11, [#allocation6]  }
   0xc   :  { %s55_s12 = sshll.u32 %s642_s0, 4  ;;  %s643_s13 = smov 128   ;;  %s56_s12 = int_to_ptr.vmem [resolvable:$true] %s55_s12 }
   0xd   :  { %s644_s14 = smov 8  }
   0xe   :  { %61 = dma.hbm_to_vmem [thread:$0]  %s54_s9, 8192, %s56_s12, [#allocation9], %s643_s13, %s643_s13, %s644_s14  }
   0xf   :  { %629 = dma.done.wait [#allocation3], 16  }
  0x10   :  { %630 = vsyncadd [#allocation3], 4294967280 }
  0x11   :  { %631 = dma.done.wait [#allocation6], 8256  }
  0x12   :  { %632 = vsyncadd [#allocation6], 4294959040 }
  0x13   :  { %633 = dma.done.wait [#allocation9], 8192  }
  0x14   :  { %634 = vsyncadd [#allocation9], 4294959104  ;;  %v141_v0 = vld [vmem:[#allocation5 + $0x1e0] sm:$0xff]  ;;  %v142_v1 = vld [vmem:[#allocation5 + $0x1e8] sm:$0xff]  ;;  %s645_s15 = smov [#allocation10]   ;;  %s468_s19 = sshll.u32 %s721_s5, 4  ;;  %s469_s19 = int_to_ptr.hbm [resolvable:$true] %s468_s19 }
  0x15   :  { %v143_v2 = vld [vmem:[#allocation5 + $0x1f0] sm:$0xff]  ;;  %155 = vmatpush.msra.mxu0 %v141_v0  ;;  %175 = vmatpush.msra.mxu1 %v142_v1  ;;  %v144_v3 = vld [vmem:[#allocation5 + $0x1f8] sm:$0xff]  ;;  %v137_v4 = vld [vmem:[#allocation5 + $0x1c0] sm:$0xff]  ;;  %s466_s16 = sshll.u32 %s645_s15, 4  ;;  %s467_s16 = int_to_ptr.vmem [resolvable:$true] %s466_s16 }
  0x16   :  { %v138_v5 = vld [vmem:[#allocation5 + $0x1c8] sm:$0xff]  ;;  %195 = vmatpush.msra.mxu2 %v143_v2  ;;  %215 = vmatpush.msra.mxu3 %v144_v3  ;;  %v139_v6 = vld [vmem:[#allocation5 + $0x1d0] sm:$0xff]  ;;  %v140_v7 = vld [vmem:[#allocation5 + $0x1d8] sm:$0xff] }
  0x17   :  { %v133_v8 = vld [vmem:[#allocation5 + $0x1a0] sm:$0xff]  ;;  %156 = vmatpush.msra.mxu0 %v137_v4  ;;  %176 = vmatpush.msra.mxu1 %v138_v5  ;;  %v134_v9 = vld [vmem:[#allocation5 + $0x1a8] sm:$0xff]  ;;  %v135_v10 = vld [vmem:[#allocation5 + $0x1b0] sm:$0xff] }
  0x18   :  { %v136_v11 = vld [vmem:[#allocation5 + $0x1b8] sm:$0xff]  ;;  %196 = vmatpush.msra.mxu2 %v139_v6  ;;  %216 = vmatpush.msra.mxu3 %v140_v7  ;;  %v129_v12 = vld [vmem:[#allocation5 + $0x180] sm:$0xff]  ;;  %v130_v13 = vld [vmem:[#allocation5 + $0x188] sm:$0xff] }
  0x19   :  { %157 = vmatpush.msra.mxu0 %v133_v8  ;;  %177 = vmatpush.msra.mxu1 %v134_v9  ;;  %v131_v14 = vld [vmem:[#allocation5 + $0x190] sm:$0xff]  ;;  %v132_v15 = vld [vmem:[#allocation5 + $0x198] sm:$0xff]  ;;  %v125_v16 = vld [vmem:[#allocation5 + $0x160] sm:$0xff] }
  0x1a   :  { %197 = vmatpush.msra.mxu2 %v135_v10  ;;  %217 = vmatpush.msra.mxu3 %v136_v11  ;;  %v126_v17 = vld [vmem:[#allocation5 + $0x168] sm:$0xff]  ;;  %v127_v18 = vld [vmem:[#allocation5 + $0x170] sm:$0xff]  ;;  %v128_v19 = vld [vmem:[#allocation5 + $0x178] sm:$0xff] }
  0x1b   :  { %158 = vmatpush.msra.mxu0 %v129_v12  ;;  %178 = vmatpush.msra.mxu1 %v130_v13  ;;  %v121_v20 = vld [vmem:[#allocation5 + $0x140] sm:$0xff]  ;;  %v122_v21 = vld [vmem:[#allocation5 + $0x148] sm:$0xff]  ;;  %v123_v22 = vld [vmem:[#allocation5 + $0x150] sm:$0xff] }
  0x1c   :  { %198 = vmatpush.msra.mxu2 %v131_v14  ;;  %218 = vmatpush.msra.mxu3 %v132_v15  ;;  %v124_v23 = vld [vmem:[#allocation5 + $0x158] sm:$0xff]  ;;  %v117_v24 = vld [vmem:[#allocation5 + $0x120] sm:$0xff]  ;;  %v118_v25 = vld [vmem:[#allocation5 + $0x128] sm:$0xff] }
  0x1d   :  { %159 = vmatpush.msra.mxu0 %v125_v16  ;;  %179 = vmatpush.msra.mxu1 %v126_v17  ;;  %v119_v26 = vld [vmem:[#allocation5 + $0x130] sm:$0xff]  ;;  %v120_v27 = vld [vmem:[#allocation5 + $0x138] sm:$0xff]  ;;  %v113_v28 = vld [vmem:[#allocation5 + $0x100] sm:$0xff] }
  0x1e   :  { %199 = vmatpush.msra.mxu2 %v127_v18  ;;  %219 = vmatpush.msra.mxu3 %v128_v19  ;;  %v114_v29 = vld [vmem:[#allocation5 + $0x108] sm:$0xff]  ;;  %v115_v30 = vld [vmem:[#allocation5 + $0x110] sm:$0xff]  ;;  %v116_v31 = vld [vmem:[#allocation5 + $0x118] sm:$0xff] }
  0x1f   :  { %160 = vmatpush.msra.mxu0 %v121_v20  ;;  %180 = vmatpush.msra.mxu1 %v122_v21  ;;  %v109_v32 = vld [vmem:[#allocation5 + $0xe0] sm:$0xff]  ;;  %v110_v33 = vld [vmem:[#allocation5 + $0xe8] sm:$0xff]  ;;  %v111_v34 = vld [vmem:[#allocation5 + $0xf0] sm:$0xff] }
  0x20   :  { %200 = vmatpush.msra.mxu2 %v123_v22  ;;  %220 = vmatpush.msra.mxu3 %v124_v23  ;;  %v112_v35 = vld [vmem:[#allocation5 + $0xf8] sm:$0xff]  ;;  %v105_v36 = vld [vmem:[#allocation5 + $0xc0] sm:$0xff]  ;;  %v106_v37 = vld [vmem:[#allocation5 + $0xc8] sm:$0xff] }
  0x21   :  { %161 = vmatpush.msra.mxu0 %v117_v24  ;;  %181 = vmatpush.msra.mxu1 %v118_v25  ;;  %v107_v38 = vld [vmem:[#allocation5 + $0xd0] sm:$0xff]  ;;  %v108_v39 = vld [vmem:[#allocation5 + $0xd8] sm:$0xff]  ;;  %v101_v40 = vld [vmem:[#allocation5 + $0xa0] sm:$0xff] }
  0x22   :  { %201 = vmatpush.msra.mxu2 %v119_v26  ;;  %221 = vmatpush.msra.mxu3 %v120_v27  ;;  %v102_v41 = vld [vmem:[#allocation5 + $0xa8] sm:$0xff]  ;;  %v103_v42 = vld [vmem:[#allocation5 + $0xb0] sm:$0xff]  ;;  %v104_v43 = vld [vmem:[#allocation5 + $0xb8] sm:$0xff] }
  0x23   :  { %162 = vmatpush.msra.mxu0 %v113_v28  ;;  %182 = vmatpush.msra.mxu1 %v114_v29  ;;  %v97_v44 = vld [vmem:[#allocation5 + $0x80] sm:$0xff]  ;;  %v98_v45 = vld [vmem:[#allocation5 + $0x88] sm:$0xff]  ;;  %v99_v46 = vld [vmem:[#allocation5 + $0x90] sm:$0xff] }
  0x24   :  { %202 = vmatpush.msra.mxu2 %v115_v30  ;;  %222 = vmatpush.msra.mxu3 %v116_v31  ;;  %v100_v47 = vld [vmem:[#allocation5 + $0x98] sm:$0xff]  ;;  %v93_v48 = vld [vmem:[#allocation5 + $0x60] sm:$0xff]  ;;  %v94_v49 = vld [vmem:[#allocation5 + $0x68] sm:$0xff] }
  0x25   :  { %163 = vmatpush.msra.mxu0 %v109_v32  ;;  %183 = vmatpush.msra.mxu1 %v110_v33  ;;  %v95_v50 = vld [vmem:[#allocation5 + $0x70] sm:$0xff]  ;;  %v96_v51 = vld [vmem:[#allocation5 + $0x78] sm:$0xff]  ;;  %v89_v52 = vld [vmem:[#allocation5 + $0x40] sm:$0xff] }
  0x26   :  { %203 = vmatpush.msra.mxu2 %v111_v34  ;;  %223 = vmatpush.msra.mxu3 %v112_v35  ;;  %v90_v53 = vld [vmem:[#allocation5 + $0x48] sm:$0xff]  ;;  %v91_v54 = vld [vmem:[#allocation5 + $0x50] sm:$0xff]  ;;  %v92_v55 = vld [vmem:[#allocation5 + $0x58] sm:$0xff] }
  0x27   :  { %164 = vmatpush.msra.mxu0 %v105_v36  ;;  %184 = vmatpush.msra.mxu1 %v106_v37  ;;  %v85_v56 = vld [vmem:[#allocation5 + $0x20] sm:$0xff]  ;;  %v86_v57 = vld [vmem:[#allocation5 + $0x28] sm:$0xff]  ;;  %v87_v58 = vld [vmem:[#allocation5 + $0x30] sm:$0xff] }
  0x28   :  { %204 = vmatpush.msra.mxu2 %v107_v38  ;;  %224 = vmatpush.msra.mxu3 %v108_v39  ;;  %v88_v59 = vld [vmem:[#allocation5 + $0x38] sm:$0xff]  ;;  %v81_v60 = vld [vmem:[#allocation5] sm:$0xff]  ;;  %v82_v61 = vld [vmem:[#allocation5 + $0x8] sm:$0xff] }
  0x29   :  { %165 = vmatpush.msra.mxu0 %v101_v40  ;;  %185 = vmatpush.msra.mxu1 %v102_v41  ;;  %v83_v62 = vld [vmem:[#allocation5 + $0x10] sm:$0xff]  ;;  %v84_v63 = vld [vmem:[#allocation5 + $0x18] sm:$0xff]  ;;  %v327_v7 = vld [vmem:[#allocation8 + $0x60] sm:$0xff] }
  0x2a   :  { %205 = vmatpush.msra.mxu2 %v103_v42  ;;  %225 = vmatpush.msra.mxu3 %v104_v43  ;;  %v80_v0 = vld [vmem:[#allocation2] sm:$0x1]  ;;  %v329_v3 = vld [vmem:[#allocation8 + $0x70] sm:$0xff]  ;;  %v328_v5 = vld [vmem:[#allocation8 + $0x68] sm:$0xff] }
  0x2b   :  { %166 = vmatpush.msra.mxu0 %v97_v44  ;;  %186 = vmatpush.msra.mxu1 %v98_v45  ;;  %v330_v1 = vld [vmem:[#allocation8 + $0x78] sm:$0xff]  ;;  %v345_v4 = vld [vmem:[#allocation8 + $0xf0] sm:$0xff]  ;;  %v344_v6 = vld [vmem:[#allocation8 + $0xe8] sm:$0xff] }
  0x2c   :  { %206 = vmatpush.msra.mxu2 %v99_v46  ;;  %226 = vmatpush.msra.mxu3 %v100_v47  ;;  %v346_v2 = vld [vmem:[#allocation8 + $0xf8] sm:$0xff]  ;;  %v343_v8 = vld [vmem:[#allocation8 + $0xe0] sm:$0xff]  ;;  %v361_v13 = vld [vmem:[#allocation8 + $0x170] sm:$0xff] }
  0x2d   :  { %167 = vmatpush.msra.mxu0 %v93_v48  ;;  %187 = vmatpush.msra.mxu1 %v94_v49  ;;  %v362_v9 = vld [vmem:[#allocation8 + $0x178] sm:$0xff]  ;;  %v377_v14 = vld [vmem:[#allocation8 + $0x1f0] sm:$0xff]  ;;  %v360_v17 = vld [vmem:[#allocation8 + $0x168] sm:$0xff] }
  0x2e   :  { %207 = vmatpush.msra.mxu2 %v95_v50  ;;  %227 = vmatpush.msra.mxu3 %v96_v51  ;;  %v378_v10 = vld [vmem:[#allocation8 + $0x1f8] sm:$0xff]  ;;  %v325_v15 = vld [vmem:[#allocation8 + $0x50] sm:$0xff]  ;;  %v376_v18 = vld [vmem:[#allocation8 + $0x1e8] sm:$0xff] }
  0x2f   :  { %168 = vmatpush.msra.mxu0 %v89_v52  ;;  %188 = vmatpush.msra.mxu1 %v90_v53  ;;  %v326_v11 = vld [vmem:[#allocation8 + $0x58] sm:$0xff]  ;;  %v341_v16 = vld [vmem:[#allocation8 + $0xd0] sm:$0xff]  ;;  %v324_v19 = vld [vmem:[#allocation8 + $0x48] sm:$0xff] }
  0x30   :  { %208 = vmatpush.msra.mxu2 %v91_v54  ;;  %228 = vmatpush.msra.mxu3 %v92_v55  ;;  %v342_v12 = vld [vmem:[#allocation8 + $0xd8] sm:$0xff]  ;;  %v340_v20 = vld [vmem:[#allocation8 + $0xc8] sm:$0xff]  ;;  %v359_v21 = vld [vmem:[#allocation8 + $0x160] sm:$0xff] }
  0x31   :  { %169 = vmatpush.msra.mxu0 %v85_v56  ;;  %189 = vmatpush.msra.mxu1 %v86_v57  ;;  %v375_v22 = vld [vmem:[#allocation8 + $0x1e0] sm:$0xff]  ;;  %v358_v25 = vld [vmem:[#allocation8 + $0x158] sm:$0xff]  ;;  %v357_v29 = vld [vmem:[#allocation8 + $0x150] sm:$0xff] }
  0x32   :  { %209 = vmatpush.msra.mxu2 %v87_v58  ;;  %229 = vmatpush.msra.mxu3 %v88_v59  ;;  %v323_v23 = vld [vmem:[#allocation8 + $0x40] sm:$0xff]  ;;  %v374_v26 = vld [vmem:[#allocation8 + $0x1d8] sm:$0xff]  ;;  %v373_v30 = vld [vmem:[#allocation8 + $0x1d0] sm:$0xff] }
  0x33   :  { %170 = vmatpush.msra.mxu0 %v81_v60  ;;  %190 = vmatpush.msra.mxu1 %v82_v61  ;;  %v339_v24 = vld [vmem:[#allocation8 + $0xc0] sm:$0xff]  ;;  %v322_v27 = vld [vmem:[#allocation8 + $0x38] sm:$0xff]  ;;  %v321_v31 = vld [vmem:[#allocation8 + $0x30] sm:$0xff] }
  0x34   :  { %210 = vmatpush.msra.mxu2 %v83_v62  ;;  %230 = vmatpush.msra.mxu3 %v84_v63  ;;  %v338_v28 = vld [vmem:[#allocation8 + $0xb8] sm:$0xff]  ;;  %v337_v32 = vld [vmem:[#allocation8 + $0xb0] sm:$0xff]  ;;  %v356_v33 = vld [vmem:[#allocation8 + $0x148] sm:$0xff] }
  0x35   :  { %171 = vmatmul.f32.vlgmr.msra.gmra.mxu0 %v80_v0  ;;  %191 = vmatmul.f32.vlgmr.msra.gmra.mxu1 %v80_v0  ;;  %v372_v34 = vld [vmem:[#allocation8 + $0x1c8] sm:$0xff]  ;;  %v355_v37 = vld [vmem:[#allocation8 + $0x140] sm:$0xff]  ;;  %v688_v38 = vld [vmem:[#allocation7] sm:$0xf] }
  0x36   :  { %211 = vmatmul.f32.vlgmr.msra.gmra.mxu2 %v80_v0  ;;  %231 = vmatmul.f32.vlgmr.msra.gmra.mxu3 %v80_v0  ;;  %v320_v35 = vld [vmem:[#allocation8 + $0x28] sm:$0xff]  ;;  %v371_v39 = vld [vmem:[#allocation8 + $0x1c0] sm:$0xff]  ;;  %v354_v42 = vld [vmem:[#allocation8 + $0x138] sm:$0xff]  ;;  %v147_v44 = vperm.slane %v688_v38, 0  ;;  %v148_v45 = vperm.slane %v688_v38, 1 }
  0x37   :  { %380 = vmatpush.msrb.mxu0 %v330_v1  ;;  %400 = vmatpush.msrb.mxu1 %v346_v2  ;;  %v336_v36 = vld [vmem:[#allocation8 + $0xa8] sm:$0xff]  ;;  %v319_v40 = vld [vmem:[#allocation8 + $0x20] sm:$0xff]  ;;  %v370_v43 = vld [vmem:[#allocation8 + $0x1b8] sm:$0xff]  ;;  %v149_v2 = vperm.slane %v688_v38, 2 }
  0x38   :  { %420 = vmatpush.msrb.mxu2 %v362_v9  ;;  %440 = vmatpush.msrb.mxu3 %v378_v10  ;;  %v335_v41 = vld [vmem:[#allocation8 + $0xa0] sm:$0xff]  ;;  %v318_v46 = vld [vmem:[#allocation8 + $0x18] sm:$0xff]  ;;  %v353_v48 = vld [vmem:[#allocation8 + $0x130] sm:$0xff] }
  0x39   :  { %381 = vmatpush.msrb.mxu0 %v329_v3  ;;  %401 = vmatpush.msrb.mxu1 %v345_v4  ;;  %v334_v47 = vld [vmem:[#allocation8 + $0x98] sm:$0xff]  ;;  %v369_v49 = vld [vmem:[#allocation8 + $0x1b0] sm:$0xff]  ;;  %v352_v52 = vld [vmem:[#allocation8 + $0x128] sm:$0xff]  ;;  %v150_v3 = vperm.slane %v688_v38, 3 }
  0x3a   :  { %421 = vmatpush.msrb.mxu2 %v361_v13  ;;  %441 = vmatpush.msrb.mxu3 %v377_v14  ;;  %v317_v50 = vld [vmem:[#allocation8 + $0x10] sm:$0xff]  ;;  %v368_v55 = vld [vmem:[#allocation8 + $0x1a8] sm:$0xff]  ;;  %v351_v60 = vld [vmem:[#allocation8 + $0x120] sm:$0xff] }
  0x3b   :  { %382 = vmatpush.msrb.mxu0 %v328_v5  ;;  %402 = vmatpush.msrb.mxu1 %v344_v6  ;;  %v333_v51 = vld [vmem:[#allocation8 + $0x90] sm:$0xff]  ;;  %v316_v58 = vld [vmem:[#allocation8 + $0x8] sm:$0xff]  ;;  %v367_v61 = vld [vmem:[#allocation8 + $0x1a0] sm:$0xff] }
  0x3c   :  { %422 = vmatpush.msrb.mxu2 %v360_v17  ;;  %442 = vmatpush.msrb.mxu3 %v376_v18  ;;  %v332_v59 = vld [vmem:[#allocation8 + $0x88] sm:$0xff]  ;;  %v315_v0 = vld [vmem:[#allocation8] sm:$0xff]  ;;  %v350_v4 = vld [vmem:[#allocation8 + $0x118] sm:$0xff] }
  0x3d   :  { %383 = vmatpush.msrb.mxu0 %v327_v7  ;;  %403 = vmatpush.msrb.mxu1 %v343_v8  ;;  %v331_v1 = vld [vmem:[#allocation8 + $0x80] sm:$0xff]  ;;  %v366_v5 = vld [vmem:[#allocation8 + $0x198] sm:$0xff]  ;;  %v349_v6 = vld [vmem:[#allocation8 + $0x110] sm:$0xff] }
  0x3e   :  { %423 = vmatpush.msrb.mxu2 %v359_v21  ;;  %443 = vmatpush.msrb.mxu3 %v375_v22  ;;  %v365_v7 = vld [vmem:[#allocation8 + $0x190] sm:$0xff]  ;;  %v348_v10 = vld [vmem:[#allocation8 + $0x108] sm:$0xff]  ;;  %v347_v14 = vld [vmem:[#allocation8 + $0x100] sm:$0xff] }
  0x3f   :  { %384 = vmatpush.msrb.mxu0 %v326_v11  ;;  %404 = vmatpush.msrb.mxu1 %v342_v12  ;;  %v364_v11 = vld [vmem:[#allocation8 + $0x188] sm:$0xff] }
  0x40   :  { %424 = vmatpush.msrb.mxu2 %v358_v25  ;;  %444 = vmatpush.msrb.mxu3 %v374_v26 }
  0x41   :  { %385 = vmatpush.msrb.mxu0 %v325_v15  ;;  %405 = vmatpush.msrb.mxu1 %v341_v16  ;;  %v363_v15 = vld [vmem:[#allocation8 + $0x180] sm:$0xff] }
  0x42   :  { %425 = vmatpush.msrb.mxu2 %v357_v29  ;;  %445 = vmatpush.msrb.mxu3 %v373_v30 }
  0x43   :  { %386 = vmatpush.msrb.mxu0 %v324_v19  ;;  %406 = vmatpush.msrb.mxu1 %v340_v20 }
  0x44   :  { %426 = vmatpush.msrb.mxu2 %v356_v33  ;;  %446 = vmatpush.msrb.mxu3 %v372_v34 }
  0x45   :  { %387 = vmatpush.msrb.mxu0 %v323_v23  ;;  %407 = vmatpush.msrb.mxu1 %v339_v24 }
  0x46   :  { %427 = vmatpush.msrb.mxu2 %v355_v37  ;;  %447 = vmatpush.msrb.mxu3 %v371_v39 }
  0x47   :  { %388 = vmatpush.msrb.mxu0 %v322_v27  ;;  %408 = vmatpush.msrb.mxu1 %v338_v28 }
  0x48   :  { %428 = vmatpush.msrb.mxu2 %v354_v42  ;;  %448 = vmatpush.msrb.mxu3 %v370_v43 }
  0x49   :  { %389 = vmatpush.msrb.mxu0 %v321_v31  ;;  %409 = vmatpush.msrb.mxu1 %v337_v32 }
  0x4a   :  { %429 = vmatpush.msrb.mxu2 %v353_v48  ;;  %449 = vmatpush.msrb.mxu3 %v369_v49 }
  0x4b   :  { %390 = vmatpush.msrb.mxu0 %v320_v35  ;;  %410 = vmatpush.msrb.mxu1 %v336_v36 }
  0x4c   :  { %430 = vmatpush.msrb.mxu2 %v352_v52  ;;  %450 = vmatpush.msrb.mxu3 %v368_v55 }
  0x4d   :  { %391 = vmatpush.msrb.mxu0 %v319_v40  ;;  %411 = vmatpush.msrb.mxu1 %v335_v41 }
  0x4e   :  { %431 = vmatpush.msrb.mxu2 %v351_v60  ;;  %451 = vmatpush.msrb.mxu3 %v367_v61 }
  0x4f   :  { %392 = vmatpush.msrb.mxu0 %v318_v46  ;;  %412 = vmatpush.msrb.mxu1 %v334_v47 }
  0x50   :  { %432 = vmatpush.msrb.mxu2 %v350_v4  ;;  %452 = vmatpush.msrb.mxu3 %v366_v5 }
  0x51   :  { %393 = vmatpush.msrb.mxu0 %v317_v50  ;;  %413 = vmatpush.msrb.mxu1 %v333_v51 }
  0x52   :  { %433 = vmatpush.msrb.mxu2 %v349_v6  ;;  %453 = vmatpush.msrb.mxu3 %v365_v7  ;;  %v379_v6 = vld [vmem:[%s720_s4] sm:$0x1] }
  0x53   :  { %394 = vmatpush.msrb.mxu0 %v316_v58  ;;  %414 = vmatpush.msrb.mxu1 %v332_v59 }
  0x54   :  { %434 = vmatpush.msrb.mxu2 %v348_v10  ;;  %454 = vmatpush.msrb.mxu3 %v364_v11 }
  0x55   :  { %395 = vmatpush.msrb.mxu0 %v315_v0  ;;  %415 = vmatpush.msrb.mxu1 %v331_v1 }
  0x56   :  { %435 = vmatpush.msrb.mxu2 %v347_v14  ;;  %455 = vmatpush.msrb.mxu3 %v363_v15 }
  0xb2   :  { %v172_v53 = vpop.f32.mrf.mxu0  ;;  %v192_v54 = vpop.f32.mrf.mxu1 }
  0xb3   :  { %v692_v56 = vadd.f32 %v172_v53, %v147_v44  ;;  %v694_v57 = vadd.f32 %v192_v54, %v148_v45 }
  0xb5   :  { %v480_v62 = vmul.f32 -1.442695, %v692_v56  ;;  %v481_v63 = vmul.f32 -1.442695, %v694_v57 }
  0xb7   :  { %493 = vpow2.f32 %v480_v62 }
  0xb8   :  { %495 = vpow2.f32 %v481_v63 }
  0xb9   :  { %v212_v8 = vpop.f32.mrf.mxu2  ;;  %v232_v9 = vpop.f32.mrf.mxu3 }
  0xba   :  { %v700_v12 = vadd.f32 %v212_v8, %v149_v2  ;;  %v702_v13 = vadd.f32 %v232_v9, %v150_v3 }
  0xbc   :  { %v482_v16 = vmul.f32 -1.442695, %v700_v12  ;;  %v483_v17 = vmul.f32 -1.442695, %v702_v13 }
  0xbd   :  { %v494_v18 = vpop.eup %493 }
  0xbe   :  { %v496_v19 = vpop.eup %495  ;;  %v247_v20 = vadd.f32 1.0, %v494_v18  ;;  %497 = vpow2.f32 %v482_v16 }
  0xbf   :  { %v248_v21 = vadd.f32 1.0, %v496_v19  ;;  %499 = vpow2.f32 %v483_v17 }
  0xc0   :  { %501 = vrcp.f32 %v247_v20  ;;  %vm256_vm0 = vweird.f32 %v247_v20  ;;  %v260_v31 = vand.u32 2147483647, %v247_v20  ;;  %v262_v32 = vand.u32 2147483648, %v247_v20 }
  0xc1   :  { %503 = vrcp.f32 %v248_v21  ;;  %v275_v35 = vand.u32 2147483647, %v248_v21  ;;  %v277_v36 = vand.u32 2147483648, %v248_v21  ;;  %vm271_vm2 = vweird.f32 %v248_v21 }
  0xc2   :  { %v263_v40 = vor.u32 1.1754944e-38, %v262_v32  ;;  %vm261_vm5 = vcmp.eq.f32.partialorder %v260_v31, 8.507059e+37 }
  0xc3   :  { %vm276_vm7 = vcmp.eq.f32.partialorder %v275_v35, 8.507059e+37  ;;  %v278_v45 = vor.u32 1.1754944e-38, %v277_v36 }
  0xc4   :  { %v498_v22 = vpop.eup %497 }
  0xc5   :  { %v500_v23 = vpop.eup %499  ;;  %v249_v24 = vadd.f32 1.0, %v498_v22 }
  0xc6   :  { %v502_v25 = vpop.eup %501  ;;  %v250_v26 = vadd.f32 1.0, %v500_v23 }
  0xc7   :  { %v504_v27 = vpop.eup %503  ;;  %v252_v28 = vmul.f32 %v502_v25, %v247_v20  ;;  %505 = vrcp.f32 %v249_v24  ;;  %vm257_vm1 = vweird.f32 %v502_v25  ;;  %v290_v52 = vand.u32 2147483647, %v249_v24 }
  0xc8   :  { %v267_v29 = vmul.f32 %v504_v27, %v248_v21  ;;  %507 = vrcp.f32 %v250_v26  ;;  %vm272_vm3 = vweird.f32 %v504_v27  ;;  %vm258_vm4 = vmor %vm256_vm0, %vm257_vm1  ;;  %v292_v53 = vand.u32 2147483648, %v249_v24 }
  0xc9   :  { %v253_v30 = vsub.f32 1.0, %v252_v28  ;;  %vm273_vm6 = vmor %vm271_vm2, %vm272_vm3  ;;  %vm286_vm9 = vweird.f32 %v249_v24  ;;  %v307_v59 = vand.u32 2147483648, %v250_v26  ;;  %v305_v62 = vand.u32 2147483647, %v250_v26 }
  0xca   :  { %v268_v33 = vsub.f32 1.0, %v267_v29  ;;  %v293_v63 = vor.u32 1.1754944e-38, %v292_v53  ;;  %vm291_vm12 = vcmp.eq.f32.partialorder %v290_v52, 8.507059e+37  ;;  %vm301_vm13 = vweird.f32 %v250_v26 }
  0xcb   :  { %v254_v34 = vmul.f32 %v502_v25, %v253_v30  ;;  %vm306_vm15 = vcmp.eq.f32.partialorder %v305_v62, 8.507059e+37 }
  0xcc   :  { %v269_v37 = vmul.f32 %v504_v27, %v268_v33 }
  0xcd   :  { %v506_v38 = vpop.eup %505  ;;  %v255_v39 = vadd.f32 %v502_v25, %v254_v34 }
  0xce   :  { %v270_v41 = vadd.f32 %v504_v27, %v269_v37  ;;  %v282_v42 = vmul.f32 %v506_v38, %v249_v24  ;;  %v508_v43 = vpop.eup %507  ;;  %vm287_vm8 = vweird.f32 %v506_v38 }
  0xcf   :  { %v259_v44 = vsel %vm258_vm4, %v502_v25, %v255_v39  ;;  %v297_v49 = vmul.f32 %v508_v43, %v250_v26  ;;  %vm302_vm10 = vweird.f32 %v508_v43  ;;  %vm288_vm11 = vmor %vm286_vm9, %vm287_vm8 }
  0xd0   :  { %v264_v46 = vsel %vm261_vm5, %v263_v40, %v259_v44  ;;  %v274_v47 = vsel %vm273_vm6, %v504_v27, %v270_v41  ;;  %v283_v48 = vsub.f32 1.0, %v282_v42  ;;  %vm303_vm14 = vmor %vm301_vm13, %vm302_vm10 }
  0xd1   :  { %v311_v50 = vmul.f32 %v264_v46, %v692_v56  ;;  %v279_v51 = vsel %vm276_vm7, %v278_v45, %v274_v47  ;;  %v298_v58 = vsub.f32 1.0, %v297_v49 }
  0xd2   :  { %v312_v54 = vmul.f32 %v279_v51, %v694_v57  ;;  %v284_v55 = vmul.f32 %v506_v38, %v283_v48  ;;  %v308_v57 = vor.u32 1.1754944e-38, %v307_v59 }
  0xd3   :  { %396 = vmatmul.f32.vlgmr.msrb.gmra.mxu0 %v311_v50  ;;  %v299_v61 = vmul.f32 %v508_v43, %v298_v58 }
  0xd4   :  { %v285_v60 = vadd.f32 %v506_v38, %v284_v55  ;;  %416 = vmatmul.f32.vlgmr.msrb.gmra.mxu1 %v312_v54 }
  0xd5   :  { %v300_v56 = vadd.f32 %v508_v43, %v299_v61 }
  0xd6   :  { %v289_v0 = vsel %vm288_vm11, %v506_v38, %v285_v60 }
  0xd7   :  { %v294_v1 = vsel %vm291_vm12, %v293_v63, %v289_v0  ;;  %v304_v3 = vsel %vm303_vm14, %v508_v43, %v300_v56 }
  0xd8   :  { %v313_v2 = vmul.f32 %v294_v1, %v700_v12  ;;  %v309_v4 = vsel %vm306_vm15, %v308_v57, %v304_v3 }
  0xd9   :  { %v314_v5 = vmul.f32 %v309_v4, %v702_v13 }
  0xda   :  { %436 = vmatmul.f32.vlgmr.msrb.gmra.mxu2 %v313_v2 }
  0xdb   :  { %456 = vmatmul.f32.vlgmr.msrb.gmra.mxu3 %v314_v5 }
 0x150   :  { %v397_v7 = vpop.f32.mrf.mxu0 }
 0x151   :  { %v398_v8 = vadd.f32 %v397_v7, %v379_v6  ;;  %v417_v9 = vpop.f32.mrf.mxu1 }
 0x153   :  { %v418_v10 = vadd.f32 %v417_v9, %v398_v8 }
 0x15d   :  { %v437_v11 = vpop.f32.mrf.mxu2 }
 0x15e   :  { %v438_v12 = vadd.f32 %v437_v11, %v418_v10  ;;  %v457_v14 = vpop.f32.mrf.mxu3 }
 0x160   :  { %v458_v13 = vadd.f32 %v457_v14, %v438_v12 }
 0x162   :  { %460 = vst [vmem:[#allocation10] sm:$0x1] %v458_v13 }
 0x163   :  { %471 = dma.vmem_to_hbm [thread:$0]  %s467_s16, 16, %s469_s19, [#allocation4]  }
 0x164   :  { %635 = dma.done.wait [#allocation4], 16  }
 0x165   :  { %636 = vsyncadd [#allocation4], 4294967280 }
 0x166   :  { %476 = vsyncpa [#allocation3], 1 }
 0x167   :  { %477 = vsyncpa [#allocation6], 1 }
 0x168   :  { %478 = vsyncpa [#allocation9], 1 }
 0x169   :  { %479 = vsyncpa [#allocation4], 1 }

</bundles_post_ra>
